<compile_context>
chip_gen: v6e
topology: v6e:2x2x1
jax: 0.10.0
libtpu: 0.0.40
codegen_flags: <defaults>
</compile_context>

<pallas_src>
import functools

import jax
import jax.numpy as jnp
from jax.experimental import pallas as pl
from jax.experimental.pallas import tpu as pltpu


def _round_up(x: int, m: int) -> int:
    return ((x + m - 1) // m) * m


def _fused_mlp_kernel(x_ref, wb_ref, bb_ref, wh_ref, bh_ref, o_ref):
    """out = relu(x @ Wb + bb) @ Wh + bh   (bf16 MXU matmuls, f32 accum/VPU)."""
    # body: [TM, Dp] (bf16) @ [Dp, Hp] (bf16) -> f32 accumulator (MXU)
    h = jnp.dot(x_ref[...], wb_ref[...], preferred_element_type=jnp.float32)
    h = jnp.maximum(h + bb_ref[...], 0.0)             # f32 bias + ReLU (VPU)
    # head (or fixed head): [TM, Hp] (bf16) @ [Hp, Cp] (bf16) -> f32 accumulator
    out = jnp.dot(h.astype(wh_ref.dtype), wh_ref[...],
                  preferred_element_type=jnp.float32)
    o_ref[...] = (out + bh_ref[...]).astype(o_ref.dtype)   # lane-dense full vst


@functools.partial(jax.jit, static_argnames=("tm",))
def _modelsplit_forward(x_flat, w_body, b_body, w_head, b_head, *, tm):
    """x_flat: [B, D] f32. w_body: [H, D], w_head: [C, H] (torch Linear layout)."""
    B, D = x_flat.shape
    Hdim = w_body.shape[0]
    C = w_head.shape[0]

    D_pad = _round_up(D, 128)
    H_pad = _round_up(Hdim, 128)
    C_pad = _round_up(C, 128)
    B_pad = _round_up(max(B, 1), tm)

    # Zero-padded, pre-transposed, bf16 operands (zero padding is exact).
    xb = jnp.zeros((B_pad, D_pad), jnp.bfloat16).at[:B, :D].set(
        x_flat.astype(jnp.bfloat16))
    wb = jnp.zeros((D_pad, H_pad), jnp.bfloat16).at[:D, :Hdim].set(
        w_body.T.astype(jnp.bfloat16))
    bb = jnp.zeros((1, H_pad), jnp.float32).at[:, :Hdim].set(
        b_body.reshape(1, -1).astype(jnp.float32))
    wh = jnp.zeros((H_pad, C_pad), jnp.bfloat16).at[:Hdim, :C].set(
        w_head.T.astype(jnp.bfloat16))
    bh = jnp.zeros((1, C_pad), jnp.float32).at[:, :C].set(
        b_head.reshape(1, -1).astype(jnp.float32))

    grid = (B_pad // tm,)

    cost = pl.CostEstimate(
        flops=2 * B_pad * (D_pad * H_pad + H_pad * C_pad),
        transcendentals=0,
        bytes_accessed=(xb.size * 2 + wb.size * 2 + wh.size * 2
                        + bb.size * 4 + bh.size * 4 + B_pad * C_pad * 4),
    )

    out_pad = pl.pallas_call(
        _fused_mlp_kernel,
        out_shape=jax.ShapeDtypeStruct((B_pad, C_pad), jnp.float32),
        grid_spec=pltpu.PrefetchScalarGridSpec(
            num_scalar_prefetch=0,
            grid=grid,
            in_specs=[
                # activation stream: tiled over batch, double-buffered by Pallas
                pl.BlockSpec((tm, D_pad), lambda i: (i, 0)),
                # weights / biases: constant block index -> fetched once,
                # VMEM-resident across the whole batch loop
                pl.BlockSpec((D_pad, H_pad), lambda i: (0, 0)),
                pl.BlockSpec((1, H_pad), lambda i: (0, 0)),
                pl.BlockSpec((H_pad, C_pad), lambda i: (0, 0)),
                pl.BlockSpec((1, C_pad), lambda i: (0, 0)),
            ],
            out_specs=pl.BlockSpec((tm, C_pad), lambda i: (i, 0)),
        ),
        compiler_params=pltpu.CompilerParams(
            dimension_semantics=("parallel",),          # megacore on v7x
            vmem_limit_bytes=32 * 1024 * 1024,          # safe on v5e/v6e/v7x
        ),
        cost_estimate=cost,
    )(xb, wb, bb, wh, bh)

    return out_pad[:B, :C]


def init_params(key, d_in, hidden, num_classes):
    """Deterministic synthetic params in PyTorch Linear layout ([out, in])."""
    k1, k2, k3, k4, k5, k6 = jax.random.split(key, 6)
    s_b = 1.0 / jnp.sqrt(d_in)
    s_h = 1.0 / jnp.sqrt(hidden)
    return {
        "body_w": jax.random.uniform(k1, (hidden, d_in), jnp.float32, -s_b, s_b),
        "body_b": jax.random.uniform(k2, (hidden,), jnp.float32, -s_b, s_b),
        "head_w": jax.random.uniform(k3, (num_classes, hidden), jnp.float32, -s_h, s_h),
        "head_b": jax.random.uniform(k4, (num_classes,), jnp.float32, -s_h, s_h),
        # fixed head: independent copy (re-initialized deterministically here)
        "fixed_head_w": jax.random.uniform(k5, (num_classes, hidden), jnp.float32, -s_h, s_h),
        "fixed_head_b": jax.random.uniform(k6, (num_classes,), jnp.float32, -s_h, s_h),
    }


def model_split_apply(params, x_nchw, use_fixed_head=False):
    """Mirrors ModelSplit.forward: body -> relu -> (head | fixed_head)."""
    B = x_nchw.shape[0]
    d_in = x_nchw.shape[1] * x_nchw.shape[2] * x_nchw.shape[3]
    x_flat = x_nchw.reshape(B, d_in)                       # torch .view(B, -1)
    if use_fixed_head:                                     # head selection = glue
        w_head, b_head = params["fixed_head_w"], params["fixed_head_b"]
    else:
        w_head, b_head = params["head_w"], params["head_b"]
    # Batch tile: at least one MXU-native 128-row tile; grow up to 512 rows
    # for larger batches (VMEM-roofline sweet spot, <= ~1 MiB per x buffer here).
    tm = min(512, _round_up(max(B, 1), 128))
    return _modelsplit_forward(
        x_flat, params["body_w"], params["body_b"], w_head, b_head, tm=tm
    )


if __name__ == "__main__":
    # Small shapes consistent with a CNN-style NCHW input.
    B, C, H, W = 2, 4, 16, 16
    HIDDEN = 32
    NUM_CLASSES = 10
    D_IN = C * H * W

    key = jax.random.PRNGKey(0)
    kx, kp = jax.random.split(key)
    x = jax.random.normal(kx, (B, C, H, W), dtype=jnp.float32)
    params = init_params(kp, D_IN, HIDDEN, NUM_CLASSES)

    # Default path (trainable head).
    out = jax.block_until_ready(model_split_apply(params, x, use_fixed_head=False))
    # Fixed-head path (use_fixed_head(True)); same shapes -> same executable.
    out_fixed = jax.block_until_ready(model_split_apply(params, x, use_fixed_head=True))

    assert out.shape == (B, NUM_CLASSES)
    assert out_fixed.shape == (B, NUM_CLASSES)

    # Reference 1: plain JAX with the same bf16 weight/activation casts
    # (matches the kernel's math; tight tolerance).
    x_flat = x.reshape(B, -1)
    h_ref = jnp.maximum(
        jnp.dot(x_flat.astype(jnp.bfloat16), params["body_w"].T.astype(jnp.bfloat16),
                preferred_element_type=jnp.float32) + params["body_b"], 0.0)
    ref_bf16 = jnp.dot(h_ref.astype(jnp.bfloat16),
                       params["head_w"].T.astype(jnp.bfloat16),
                       preferred_element_type=jnp.float32) + params["head_b"]
    assert jnp.allclose(out, ref_bf16, atol=2e-3, rtol=2e-3), "bf16-matched ref mismatch"

    # Reference 2: full-f32 PyTorch-equivalent forward (loose tolerance for bf16).
    ref_f32 = jnp.maximum(x_flat @ params["body_w"].T + params["body_b"], 0.0)
    ref_f32 = ref_f32 @ params["head_w"].T + params["head_b"]
    assert jnp.allclose(out, ref_f32, atol=5e-2), "f32 reference mismatch"

    ref_fixed = jnp.maximum(x_flat @ params["body_w"].T + params["body_b"], 0.0)
    ref_fixed = ref_fixed @ params["fixed_head_w"].T + params["fixed_head_b"]
    assert jnp.allclose(out_fixed, ref_fixed, atol=5e-2), "fixed-head reference mismatch"

    print("KERNEL_OK")
</pallas_src>

<mosaic_0001>
module attributes {stable_mosaic.version = 11 : i64} {
  func.func @_fused_mlp_kernel(%arg0: i32, %arg1: memref<128x1024xbf16, #tpu.memory_space<vmem>>, %arg2: memref<1024x128xbf16, #tpu.memory_space<vmem>>, %arg3: memref<1x128xf32, #tpu.memory_space<vmem>>, %arg4: memref<128x128xbf16, #tpu.memory_space<vmem>>, %arg5: memref<1x128xf32, #tpu.memory_space<vmem>>, %arg6: memref<128x128xf32, #tpu.memory_space<vmem>>) attributes {dimension_semantics = [#tpu.dimension_semantics<parallel>], iteration_bounds = array<i64: 1>, scalar_prefetch = 0 : i64, scratch_operands = 0 : i64, tpu.core_type = #tpu.core_type<tc>, window_params = [{transform_indices = @transform_0, window_bounds = array<i64: 128, 1024>}, {pipeline_mode = #tpu.pipeline_mode<synchronous>, transform_indices = @transform_1, window_bounds = array<i64: 1024, 128>}, {pipeline_mode = #tpu.pipeline_mode<synchronous>, transform_indices = @transform_2, window_bounds = array<i64: 1, 128>}, {pipeline_mode = #tpu.pipeline_mode<synchronous>, transform_indices = @transform_3, window_bounds = array<i64: 128, 128>}, {pipeline_mode = #tpu.pipeline_mode<synchronous>, transform_indices = @transform_4, window_bounds = array<i64: 1, 128>}, {transform_indices = @transform_5, window_bounds = array<i64: 128, 128>}]} {
    %c0 = arith.constant 0 : index
    %c0_0 = arith.constant 0 : index
    %0 = vector.load %arg1[%c0, %c0_0] : memref<128x1024xbf16, #tpu.memory_space<vmem>>, vector<128x1024xbf16>
    %c0_1 = arith.constant 0 : index
    %c0_2 = arith.constant 0 : index
    %1 = vector.load %arg2[%c0_1, %c0_2] : memref<1024x128xbf16, #tpu.memory_space<vmem>>, vector<1024x128xbf16>
    %cst = arith.constant dense<0.000000e+00> : vector<128x128xf32>
    %2 = tpu.matmul %0, %1, %cst {dimension_numbers = #tpu.dot_dimension_numbers<[1], [0], [0], [1], [0, 0, 1, 1], [], []>} : vector<128x1024xbf16>, vector<1024x128xbf16>, vector<128x128xf32> -> vector<128x128xf32>
    %c0_3 = arith.constant 0 : index
    %c0_4 = arith.constant 0 : index
    %3 = vector.load %arg3[%c0_3, %c0_4] : memref<1x128xf32, #tpu.memory_space<vmem>>, vector<1x128xf32>
    %4 = vector.broadcast %3 : vector<1x128xf32> to vector<128x128xf32>
    %5 = arith.addf %2, %4 : vector<128x128xf32>
    %cst_5 = arith.constant 0.000000e+00 : f32
    %6 = vector.broadcast %cst_5 : f32 to vector<128x128xf32>
    %7 = arith.maximumf %5, %6 : vector<128x128xf32>
    %8 = arith.truncf %7 : vector<128x128xf32> to vector<128x128xbf16>
    %c0_6 = arith.constant 0 : index
    %c0_7 = arith.constant 0 : index
    %9 = vector.load %arg4[%c0_6, %c0_7] : memref<128x128xbf16, #tpu.memory_space<vmem>>, vector<128x128xbf16>
    %cst_8 = arith.constant dense<0.000000e+00> : vector<128x128xf32>
    %10 = tpu.matmul %8, %9, %cst_8 {dimension_numbers = #tpu.dot_dimension_numbers<[1], [0], [0], [1], [0, 0, 1, 1], [], []>} : vector<128x128xbf16>, vector<128x128xbf16>, vector<128x128xf32> -> vector<128x128xf32>
    %c0_9 = arith.constant 0 : index
    %c0_10 = arith.constant 0 : index
    %11 = vector.load %arg5[%c0_9, %c0_10] : memref<1x128xf32, #tpu.memory_space<vmem>>, vector<1x128xf32>
    %12 = vector.broadcast %11 : vector<1x128xf32> to vector<128x128xf32>
    %13 = arith.addf %10, %12 : vector<128x128xf32>
    %c0_11 = arith.constant 0 : index
    %c0_12 = arith.constant 0 : index
    %14 = vector.load %arg6[%c0_11, %c0_12] : memref<128x128xf32, #tpu.memory_space<vmem>>, vector<128x128xf32>
    tpu.vector_store %arg6[%c0_11, %c0_12], %13 {strides = array<i32>} : memref<128x128xf32, #tpu.memory_space<vmem>>, vector<128x128xf32>,
    return
  }
  func.func @transform_0(%arg0: i32) -> (i32, i32) {
    %c0_i32 = arith.constant 0 : i32
    %c0_i32_0 = arith.constant 0 : i32
    return %arg0, %c0_i32 : i32, i32
  }
  func.func @transform_1(%arg0: i32) -> (i32, i32) {
    %c0_i32 = arith.constant 0 : i32
    %c0_i32_0 = arith.constant 0 : i32
    %c0_i32_1 = arith.constant 0 : i32
    return %c0_i32, %c0_i32_0 : i32, i32
  }
  func.func @transform_2(%arg0: i32) -> (i32, i32) {
    %c0_i32 = arith.constant 0 : i32
    %c0_i32_0 = arith.constant 0 : i32
    %c0_i32_1 = arith.constant 0 : i32
    return %c0_i32, %c0_i32_0 : i32, i32
  }
  func.func @transform_3(%arg0: i32) -> (i32, i32) {
    %c0_i32 = arith.constant 0 : i32
    %c0_i32_0 = arith.constant 0 : i32
    %c0_i32_1 = arith.constant 0 : i32
    return %c0_i32, %c0_i32_0 : i32, i32
  }
  func.func @transform_4(%arg0: i32) -> (i32, i32) {
    %c0_i32 = arith.constant 0 : i32
    %c0_i32_0 = arith.constant 0 : i32
    %c0_i32_1 = arith.constant 0 : i32
    return %c0_i32, %c0_i32_0 : i32, i32
  }
  func.func @transform_5(%arg0: i32) -> (i32, i32) {
    %c0_i32 = arith.constant 0 : i32
    %c0_i32_0 = arith.constant 0 : i32
    return %arg0, %c0_i32 : i32, i32
  }
}

</mosaic_0001>

<bundles_post_ra>
// kernel: _modelsplit_forward.1
= control target key start
LH: loop header
LB: loop body
LE: loop exit
PB: predicated region body
PF: predicated region fallthrough
CT: control target
= control target key end

     0   :  { %s2684_s1 = inlined_call_operand.vmem [shape: bf16[1024,128], index: 1, kind: input, shape index: {}]   ;;  %s2685_s0 = inlined_call_operand.vmem [shape: bf16[128,1024], index: 0, kind: input, shape index: {}]   ;;  %s2686_s3 = inlined_call_operand.vmem [shape: bf16[128,128], index: 3, kind: input, shape index: {}]   ;;  %s2687_s2 = inlined_call_operand.vmem [shape: f32[1,128], index: 2, kind: input, shape index: {}]   ;;  %s2688_s4 = inlined_call_operand.vmem [shape: f32[1,128], index: 4, kind: input, shape index: {}]   ;;  %s2689_s5 = inlined_call_operand.vmem [shape: f32[128,128], index: 5, kind: output, shape index: {}]  }
   0x1   :  { %v1982_v0 = vld [vmem:[%s2684_s1 + $0x78] sm:$0xff]   ;;  %v1986_v4 = vld [vmem:[%s2684_s1 + $0x70] sm:$0xff]   ;;  %v1990_v8 = vld [vmem:[%s2684_s1 + $0x68] sm:$0xff]  }
   0x2   :  { %v1983_v1 = vld [vmem:[%s2684_s1 + $0xf8] sm:$0xff]   ;;  %1662 = vmatprep.subr.bf16.mxu0 %v1982_v0  ;;  %v1987_v5 = vld [vmem:[%s2684_s1 + $0xf0] sm:$0xff]   ;;  %v1991_v9 = vld [vmem:[%s2684_s1 + $0xe8] sm:$0xff]  }
   0x3   :  { %v1984_v2 = vld [vmem:[%s2684_s1 + $0x38] sm:$0xff]   ;;  %1726 = vmatprep.subr.bf16.mxu1 %v1983_v1  ;;  %v1988_v6 = vld [vmem:[%s2684_s1 + $0x30] sm:$0xff]   ;;  %v1992_v10 = vld [vmem:[%s2684_s1 + $0x28] sm:$0xff]  }
   0x4   :  { %v1985_v3 = vld [vmem:[%s2684_s1 + $0xb8] sm:$0xff]   ;;  %1663 = vmatpush3.bf16.msra.mxu0 %v1984_v2  ;;  %v1989_v7 = vld [vmem:[%s2684_s1 + $0xb0] sm:$0xff]   ;;  %v1993_v11 = vld [vmem:[%s2684_s1 + $0xa8] sm:$0xff]  }
   0x5   :  { %1727 = vmatpush3.bf16.msra.mxu1 %v1985_v3  ;;  %1664 = vmatprep.subr.bf16.mxu0 %v1986_v4  ;;  %v1994_v12 = vld [vmem:[%s2684_s1 + $0x60] sm:$0xff]   ;;  %v1998_v16 = vld [vmem:[%s2684_s1 + $0x58] sm:$0xff]   ;;  %v2002_v20 = vld [vmem:[%s2684_s1 + $0x50] sm:$0xff]  }
   0x6   :  { %1728 = vmatprep.subr.bf16.mxu1 %v1987_v5  ;;  %v1995_v13 = vld [vmem:[%s2684_s1 + $0xe0] sm:$0xff]   ;;  %v1999_v17 = vld [vmem:[%s2684_s1 + $0xd8] sm:$0xff]   ;;  %v2003_v21 = vld [vmem:[%s2684_s1 + $0xd0] sm:$0xff]  }
   0x7   :  { %v1996_v14 = vld [vmem:[%s2684_s1 + $0x20] sm:$0xff]   ;;  %v2000_v18 = vld [vmem:[%s2684_s1 + $0x18] sm:$0xff]   ;;  %v2004_v22 = vld [vmem:[%s2684_s1 + $0x10] sm:$0xff]  }
   0x8   :  { %1665 = vmatpush3.bf16.msra.mxu0 %v1988_v6  ;;  %v1997_v15 = vld [vmem:[%s2684_s1 + $0xa0] sm:$0xff]   ;;  %v2001_v19 = vld [vmem:[%s2684_s1 + $0x98] sm:$0xff]   ;;  %v2005_v23 = vld [vmem:[%s2684_s1 + $0x90] sm:$0xff]  }
   0x9   :  { %1729 = vmatpush3.bf16.msra.mxu1 %v1989_v7  ;;  %1666 = vmatprep.subr.bf16.mxu0 %v1990_v8  ;;  %v2006_v24 = vld [vmem:[%s2684_s1 + $0x48] sm:$0xff]   ;;  %v2010_v28 = vld [vmem:[%s2684_s1 + $0x40] sm:$0xff]   ;;  %v2014_v40 = vld [vmem:[%s2684_s1 + $0x178] sm:$0xff]  }
   0xa   :  { %1730 = vmatprep.subr.bf16.mxu1 %v1991_v9  ;;  %v2007_v25 = vld [vmem:[%s2684_s1 + $0xc8] sm:$0xff]   ;;  %v2011_v29 = vld [vmem:[%s2684_s1 + $0xc0] sm:$0xff]   ;;  %v2015_v41 = vld [vmem:[%s2684_s1 + $0x138] sm:$0xff]  }
   0xb   :  { %v2008_v26 = vld [vmem:[%s2684_s1 + $0x8] sm:$0xff]   ;;  %v2012_v30 = vld [vmem:[%s2684_s1] sm:$0xff]   ;;  %v2016_v42 = vld [vmem:[%s2684_s1 + $0x1f8] sm:$0xff]  }
   0xc   :  { %1667 = vmatpush3.bf16.msra.mxu0 %v1992_v10  ;;  %v2009_v27 = vld [vmem:[%s2684_s1 + $0x88] sm:$0xff]   ;;  %v2013_v31 = vld [vmem:[%s2684_s1 + $0x80] sm:$0xff]   ;;  %v2017_v43 = vld [vmem:[%s2684_s1 + $0x1b8] sm:$0xff]  }
   0xd   :  { %1731 = vmatpush3.bf16.msra.mxu1 %v1993_v11  ;;  %1668 = vmatprep.subr.bf16.mxu0 %v1994_v12  ;;  %v21_v32 = vld [vmem:[%s2685_s0] sm:$0xff]  ;;  %v22_v34 = vld [vmem:[%s2685_s0 + $0x8] sm:$0xff]  ;;  %v2018_v50 = vld [vmem:[%s2684_s1 + $0x170] sm:$0xff]  }
   0xe   :  { %1732 = vmatprep.subr.bf16.mxu1 %v1995_v13  ;;  %v25_v33 = vld [vmem:[%s2685_s0 + $0x20] sm:$0xff]  ;;  %v26_v37 = vld [vmem:[%s2685_s0 + $0x28] sm:$0xff]  ;;  %v2019_v52 = vld [vmem:[%s2684_s1 + $0x130] sm:$0xff]  }
   0xf   :  { %v1525_v35 = vcombine.low %v21_v32, %v25_v33  ;;  %v1526_v36 = vcombine.high %v21_v32, %v25_v33  ;;  %v1527_v38 = vcombine.low %v22_v34, %v26_v37  ;;  %v1528_v39 = vcombine.high %v22_v34, %v26_v37  ;;  %v29_v44 = vld [vmem:[%s2685_s0 + $0x40] sm:$0xff]  ;;  %v30_v47 = vld [vmem:[%s2685_s0 + $0x48] sm:$0xff]  ;;  %v2020_v54 = vld [vmem:[%s2684_s1 + $0x1f0] sm:$0xff]  }
  0x10   :  { %1669 = vmatpush3.bf16.msra.mxu0 %v1996_v14  ;;  %v33_v45 = vld [vmem:[%s2685_s0 + $0x60] sm:$0xff]  ;;  %v34_v48 = vld [vmem:[%s2685_s0 + $0x68] sm:$0xff]  ;;  %v2021_v55 = vld [vmem:[%s2684_s1 + $0x1b0] sm:$0xff]  }
  0x11   :  { %1733 = vmatpush3.bf16.msra.mxu1 %v1997_v15  ;;  %1670 = vmatprep.subr.bf16.mxu0 %v1998_v16  ;;  %v1534_v46 = vcombine.high %v29_v44, %v33_v45  ;;  %v1536_v49 = vcombine.high %v30_v47, %v34_v48  ;;  %v1533_v51 = vcombine.low %v29_v44, %v33_v45  ;;  %v37_v56 = vld [vmem:[%s2685_s0 + $0x80] sm:$0xff]  ;;  %v38_v58 = vld [vmem:[%s2685_s0 + $0x88] sm:$0xff]  ;;  %v2036_v32 = vld [vmem:[%s2684_s1 + $0x1d0] sm:$0xff]  }
  0x12   :  { %1734 = vmatprep.subr.bf16.mxu1 %v1999_v17  ;;  %956 = vmatprep.mubr.bf16.mxu0 %v1526_v36  ;;  %v1535_v53 = vcombine.low %v30_v47, %v34_v48  ;;  %v41_v57 = vld [vmem:[%s2685_s0 + $0xa0] sm:$0xff]  ;;  %v42_v59 = vld [vmem:[%s2685_s0 + $0xa8] sm:$0xff]  ;;  %v2037_v33 = vld [vmem:[%s2684_s1 + $0x190] sm:$0xff]  }
  0x13   :  { %1053 = vmatprep.mubr.bf16.mxu1 %v1528_v39  ;;  %v1542_v60 = vcombine.high %v37_v56, %v41_v57  ;;  %v1544_v61 = vcombine.high %v38_v58, %v42_v59  ;;  %v2022_v62 = vld [vmem:[%s2684_s1 + $0x168] sm:$0xff]   ;;  %v1541_v2 = vcombine.low %v37_v56, %v41_v57  ;;  %v45_v3 = vld [vmem:[%s2685_s0 + $0xc0] sm:$0xff]  ;;  %v1543_v6 = vcombine.low %v38_v58, %v42_v59 }
  0x14   :  { %1671 = vmatpush3.bf16.msra.mxu0 %v2000_v18  ;;  %v2023_v63 = vld [vmem:[%s2684_s1 + $0x128] sm:$0xff]   ;;  %v49_v4 = vld [vmem:[%s2685_s0 + $0xe0] sm:$0xff]  ;;  %v2030_v18 = vld [vmem:[%s2684_s1 + $0x158] sm:$0xff]  }
  0x15   :  { %1735 = vmatpush3.bf16.msra.mxu1 %v2001_v19  ;;  %1672 = vmatprep.subr.bf16.mxu0 %v2002_v20  ;;  %v2024_v0 = vld [vmem:[%s2684_s1 + $0x1e8] sm:$0xff]   ;;  %v1550_v7 = vcombine.high %v45_v3, %v49_v4  ;;  %v2026_v10 = vld [vmem:[%s2684_s1 + $0x160] sm:$0xff]   ;;  %v1549_v19 = vcombine.low %v45_v3, %v49_v4  ;;  %v2031_v20 = vld [vmem:[%s2684_s1 + $0x118] sm:$0xff]  }
  0x16   :  { %1736 = vmatprep.subr.bf16.mxu1 %v2003_v21  ;;  %v2025_v1 = vld [vmem:[%s2684_s1 + $0x1a8] sm:$0xff]   ;;  %v2027_v11 = vld [vmem:[%s2684_s1 + $0x120] sm:$0xff]  }
  0x17   :  { %v46_v5 = vld [vmem:[%s2685_s0 + $0xc8] sm:$0xff]  ;;  %v2028_v12 = vld [vmem:[%s2684_s1 + $0x1e0] sm:$0xff]  }
  0x18   :  { %1673 = vmatpush3.bf16.msra.mxu0 %v2004_v22  ;;  %v50_v8 = vld [vmem:[%s2685_s0 + $0xe8] sm:$0xff]  ;;  %v2029_v13 = vld [vmem:[%s2684_s1 + $0x1a0] sm:$0xff]  }
  0x19   :  { %1737 = vmatpush3.bf16.msra.mxu1 %v2005_v23  ;;  %1674 = vmatprep.subr.bf16.mxu0 %v2006_v24  ;;  %v1552_v9 = vcombine.high %v46_v5, %v50_v8  ;;  %v53_v14 = vld [vmem:[%s2685_s0 + $0x100] sm:$0xff]  ;;  %v54_v16 = vld [vmem:[%s2685_s0 + $0x108] sm:$0xff]  ;;  %v1551_v21 = vcombine.low %v46_v5, %v50_v8  ;;  %v2032_v23 = vld [vmem:[%s2684_s1 + $0x1d8] sm:$0xff]  }
  0x1a   :  { %1738 = vmatprep.subr.bf16.mxu1 %v2007_v25  ;;  %v57_v15 = vld [vmem:[%s2685_s0 + $0x120] sm:$0xff]  ;;  %v58_v17 = vld [vmem:[%s2685_s0 + $0x128] sm:$0xff]  ;;  %v2033_v25 = vld [vmem:[%s2684_s1 + $0x198] sm:$0xff]  }
  0x1b   :  { %v1558_v22 = vcombine.high %v53_v14, %v57_v15  ;;  %v1560_v24 = vcombine.high %v54_v16, %v58_v17  ;;  %v1557_v34 = vcombine.low %v53_v14, %v57_v15  ;;  %v2039_v39 = vld [vmem:[%s2684_s1 + $0x108] sm:$0xff]   ;;  %v2043_v48 = vld [vmem:[%s2684_s1 + $0x100] sm:$0xff]   ;;  %v32_v8 = vld [vmem:[%s2685_s0 + $0x58] sm:$0xff] }
  0x1c   :  { %1675 = vmatpush3.bf16.msra.mxu0 %v2008_v26  ;;  %v61_v26 = vld [vmem:[%s2685_s0 + $0x140] sm:$0xff]  ;;  %v70_v44 = vld [vmem:[%s2685_s0 + $0x188] sm:$0xff]  ;;  %v39_v14 = vld [vmem:[%s2685_s0 + $0x90] sm:$0xff] }
  0x1d   :  { %1739 = vmatpush3.bf16.msra.mxu1 %v2009_v27  ;;  %1676 = vmatprep.subr.bf16.mxu0 %v2010_v28  ;;  %v65_v27 = vld [vmem:[%s2685_s0 + $0x160] sm:$0xff]  ;;  %v2034_v28 = vld [vmem:[%s2684_s1 + $0x150] sm:$0xff]   ;;  %v74_v45 = vld [vmem:[%s2685_s0 + $0x1a8] sm:$0xff] }
  0x1e   :  { %1740 = vmatprep.subr.bf16.mxu1 %v2011_v29  ;;  %v62_v29 = vld [vmem:[%s2685_s0 + $0x148] sm:$0xff]  ;;  %v1566_v36 = vcombine.high %v61_v26, %v65_v27  ;;  %v1565_v47 = vcombine.low %v61_v26, %v65_v27  ;;  %v1575_v59 = vcombine.low %v70_v44, %v74_v45  ;;  %v43_v15 = vld [vmem:[%s2685_s0 + $0xb0] sm:$0xff] }
  0x1f   :  { %v78_v56 = vld [vmem:[%s2685_s0 + $0x1c8] sm:$0xff]  ;;  %v1545_v26 = vcombine.low %v39_v14, %v43_v15 }
  0x20   :  { %1677 = vmatpush3.bf16.msra.mxu0 %v2012_v30  ;;  %v66_v30 = vld [vmem:[%s2685_s0 + $0x168] sm:$0xff] }
  0x21   :  { %1741 = vmatpush3.bf16.msra.mxu1 %v2013_v31  ;;  %1790 = vmatprep.subr.bf16.mxu0 %v2014_v40  ;;  %v2035_v31 = vld [vmem:[%s2684_s1 + $0x110] sm:$0xff]   ;;  %v1568_v37 = vcombine.high %v62_v29, %v66_v30  ;;  %v2040_v40 = vld [vmem:[%s2684_s1 + $0x1c8] sm:$0xff]  }
  0x22   :  { %1854 = vmatprep.subr.bf16.mxu1 %v2016_v42  ;;  %v73_v42 = vld [vmem:[%s2685_s0 + $0x1a0] sm:$0xff]  ;;  %v82_v57 = vld [vmem:[%s2685_s0 + $0x1e8] sm:$0xff] }
  0x23   :  { %957 = vmatmul.mubr.bf16.vlgmr.msra.gmra.mxu0 %v1525_v35  ;;  %v1559_v35 = vcombine.low %v54_v16, %v58_v17  ;;  %v1583_v3 = vcombine.low %v78_v56, %v82_v57  ;;  %v40_v16 = vld [vmem:[%s2685_s0 + $0x98] sm:$0xff] }
  0x24   :  { %1054 = vmatmul.mubr.bf16.vlgmr.msra.gmra.mxu1 %v1527_v38  ;;  %1791 = vmatpush3.bf16.msra.mxu0 %v2015_v41  ;;  %v2038_v38 = vld [vmem:[%s2684_s1 + $0x148] sm:$0xff]   ;;  %v69_v41 = vld [vmem:[%s2685_s0 + $0x180] sm:$0xff]  ;;  %v44_v17 = vld [vmem:[%s2685_s0 + $0xb8] sm:$0xff] }
  0x25   :  { %1855 = vmatpush3.bf16.msra.mxu1 %v2017_v43  ;;  %964 = vmatprep.mubr.bf16.mxu0 %v1534_v46  ;;  %v2041_v43 = vld [vmem:[%s2684_s1 + $0x188] sm:$0xff]   ;;  %v2042_v46 = vld [vmem:[%s2684_s1 + $0x140] sm:$0xff]   ;;  %v1573_v58 = vcombine.low %v69_v41, %v73_v42  ;;  %v1547_v27 = vcombine.low %v40_v16, %v44_v17 }
  0x26   :  { %1061 = vmatprep.mubr.bf16.mxu1 %v1536_v49  ;;  %1792 = vmatprep.subr.bf16.mxu0 %v2018_v50  ;;  %v1567_v49 = vcombine.low %v62_v29, %v66_v30  ;;  %v1574_v50 = vcombine.high %v69_v41, %v73_v42  ;;  %v55_v30 = vld [vmem:[%s2685_s0 + $0x110] sm:$0xff]  ;;  %v68_v41 = vld [vmem:[%s2685_s0 + $0x178] sm:$0xff] }
  0x27   :  { %1856 = vmatprep.subr.bf16.mxu1 %v2020_v54  ;;  %v77_v54 = vld [vmem:[%s2685_s0 + $0x1c0] sm:$0xff] }
  0x28   :  { %1793 = vmatpush3.bf16.msra.mxu0 %v2019_v52  ;;  %v1576_v52 = vcombine.high %v70_v44, %v74_v45 }
  0x29   :  { %1857 = vmatpush3.bf16.msra.mxu1 %v2021_v55  ;;  %1794 = vmatprep.subr.bf16.mxu0 %v2022_v62  ;;  %v81_v55 = vld [vmem:[%s2685_s0 + $0x1e0] sm:$0xff]  ;;  %v23_v62 = vld [vmem:[%s2685_s0 + $0x10] sm:$0xff] }
  0x2a   :  { %1858 = vmatprep.subr.bf16.mxu1 %v2024_v0  ;;  %v24_v0 = vld [vmem:[%s2685_s0 + $0x18] sm:$0xff] }
  0x2b   :  { %965 = vmatmul.mubr.bf16.gmra.mxu0 %v1533_v51  ;;  %v2044_v51 = vld [vmem:[%s2684_s1 + $0x1c0] sm:$0xff]  }
  0x2c   :  { %1062 = vmatmul.mubr.bf16.gmra.mxu1 %v1535_v53  ;;  %972 = vmatprep.mubr.bf16.mxu0 %v1542_v60  ;;  %v2045_v53 = vld [vmem:[%s2684_s1 + $0x180] sm:$0xff]   ;;  %v1582_v60 = vcombine.high %v77_v54, %v81_v55 }
  0x2d   :  { %1069 = vmatprep.mubr.bf16.mxu1 %v1544_v61  ;;  %1795 = vmatpush3.bf16.msra.mxu0 %v2023_v63  ;;  %v1584_v61 = vcombine.high %v78_v56, %v82_v57  ;;  %v27_v63 = vld [vmem:[%s2685_s0 + $0x30] sm:$0xff]  ;;  %v80_v56 = vld [vmem:[%s2685_s0 + $0x1d8] sm:$0xff] }
  0x2e   :  { %1859 = vmatpush3.bf16.msra.mxu1 %v2025_v1  ;;  %1796 = vmatprep.subr.bf16.mxu0 %v2026_v10  ;;  %v28_v1 = vld [vmem:[%s2685_s0 + $0x38] sm:$0xff]  ;;  %v1530_v4 = vcombine.high %v23_v62, %v27_v63  ;;  %v1529_v10 = vcombine.low %v23_v62, %v27_v63 }
  0x2f   :  { %1860 = vmatprep.subr.bf16.mxu1 %v2028_v12  ;;  %v1532_v5 = vcombine.high %v24_v0, %v28_v1  ;;  %v84_v57 = vld [vmem:[%s2685_s0 + $0x1f8] sm:$0xff] }
  0x30   :  { %v1587_v63 = vcombine.low %v80_v56, %v84_v57 }
  0x31   :  { %1797 = vmatpush3.bf16.msra.mxu0 %v2027_v11  ;;  %v1531_v11 = vcombine.low %v24_v0, %v28_v1  ;;  %v2046_v0 = vld [vmem:[%s2686_s3 + $0x38] sm:$0xff]   ;;  %v2047_v1 = vld [vmem:[%s2686_s3 + $0x30] sm:$0xff]  }
  0x32   :  { %1861 = vmatpush3.bf16.msra.mxu1 %v2029_v13  ;;  %1798 = vmatprep.subr.bf16.mxu0 %v2030_v18 }
  0x33   :  { %973 = vmatmul.mubr.bf16.gmra.mxu0 %v1541_v2  ;;  %1862 = vmatprep.subr.bf16.mxu1 %v2032_v23  ;;  %v1581_v2 = vcombine.low %v77_v54, %v81_v55  ;;  %v51_v23 = vld [vmem:[%s2685_s0 + $0xf0] sm:$0xff] }
  0x34   :  { %1070 = vmatmul.mubr.bf16.gmra.mxu1 %v1543_v6  ;;  %980 = vmatprep.mubr.bf16.mxu0 %v1550_v7  ;;  %v31_v6 = vld [vmem:[%s2685_s0 + $0x50] sm:$0xff] }
  0x35   :  { %1077 = vmatprep.mubr.bf16.mxu1 %v1552_v9  ;;  %1799 = vmatpush3.bf16.msra.mxu0 %v2031_v20  ;;  %v35_v7 = vld [vmem:[%s2685_s0 + $0x70] sm:$0xff]  ;;  %v36_v9 = vld [vmem:[%s2685_s0 + $0x78] sm:$0xff]  ;;  %v1546_v20 = vcombine.high %v39_v14, %v43_v15 }
  0x36   :  { %1863 = vmatpush3.bf16.msra.mxu1 %v2033_v25  ;;  %1800 = vmatprep.subr.bf16.mxu0 %v2034_v28  ;;  %v1538_v12 = vcombine.high %v31_v6, %v35_v7  ;;  %v1540_v13 = vcombine.high %v32_v8, %v36_v9  ;;  %v1537_v18 = vcombine.low %v31_v6, %v35_v7  ;;  %v52_v25 = vld [vmem:[%s2685_s0 + $0xf8] sm:$0xff]  ;;  %v79_v54 = vld [vmem:[%s2685_s0 + $0x1d0] sm:$0xff]  ;;  %v2052_v6 = vld [vmem:[%s2686_s3 + $0x8] sm:$0xff]  }
  0x37   :  { %1864 = vmatprep.subr.bf16.mxu1 %v2036_v32  ;;  %v56_v32 = vld [vmem:[%s2685_s0 + $0x118] sm:$0xff]  ;;  %v83_v55 = vld [vmem:[%s2685_s0 + $0x1f0] sm:$0xff]  ;;  %v2053_v7 = vld [vmem:[%s2686_s3] sm:$0xff]  }
  0x38   :  { %v1585_v62 = vcombine.low %v79_v54, %v83_v55 }
  0x39   :  { %1801 = vmatpush3.bf16.msra.mxu0 %v2035_v31  ;;  %v59_v31 = vld [vmem:[%s2685_s0 + $0x130] sm:$0xff] }
  0x3a   :  { %1865 = vmatpush3.bf16.msra.mxu1 %v2037_v33  ;;  %1802 = vmatprep.subr.bf16.mxu0 %v2038_v38  ;;  %v60_v33 = vld [vmem:[%s2685_s0 + $0x138] sm:$0xff]  ;;  %v63_v38 = vld [vmem:[%s2685_s0 + $0x150] sm:$0xff]  ;;  %v1561_v42 = vcombine.low %v55_v30, %v59_v31 }
  0x3b   :  { %981 = vmatmul.mubr.bf16.gmra.mxu0 %v1549_v19  ;;  %1866 = vmatprep.subr.bf16.mxu1 %v2040_v40  ;;  %v1539_v19 = vcombine.low %v32_v8, %v36_v9  ;;  %v64_v40 = vld [vmem:[%s2685_s0 + $0x158] sm:$0xff] }
  0x3c   :  { %1078 = vmatmul.mubr.bf16.gmra.mxu1 %v1551_v21  ;;  %988 = vmatprep.mubr.bf16.mxu0 %v1558_v22  ;;  %v1548_v21 = vcombine.high %v40_v16, %v44_v17  ;;  %v47_v22 = vld [vmem:[%s2685_s0 + $0xd0] sm:$0xff]  ;;  %v1572_v45 = vcombine.high %v64_v40, %v68_v41 }
  0x3d   :  { %1085 = vmatprep.mubr.bf16.mxu1 %v1560_v24  ;;  %1803 = vmatpush3.bf16.msra.mxu0 %v2039_v39  ;;  %v48_v24 = vld [vmem:[%s2685_s0 + $0xd8] sm:$0xff]  ;;  %v1554_v28 = vcombine.high %v47_v22, %v51_v23  ;;  %v67_v39 = vld [vmem:[%s2685_s0 + $0x170] sm:$0xff] }
  0x3e   :  { %1867 = vmatpush3.bf16.msra.mxu1 %v2041_v43  ;;  %1804 = vmatprep.subr.bf16.mxu0 %v2042_v46  ;;  %v1556_v29 = vcombine.high %v48_v24, %v52_v25  ;;  %v1563_v43 = vcombine.low %v56_v32, %v60_v33  ;;  %v1570_v44 = vcombine.high %v63_v38, %v67_v39  ;;  %v71_v46 = vld [vmem:[%s2685_s0 + $0x190] sm:$0xff] }
  0x3f   :  { %1868 = vmatprep.subr.bf16.mxu1 %v2044_v51  ;;  %v1571_v51 = vcombine.low %v64_v40, %v68_v41 }
  0x41   :  { %1805 = vmatpush3.bf16.msra.mxu0 %v2043_v48  ;;  %v72_v48 = vld [vmem:[%s2685_s0 + $0x198] sm:$0xff] }
  0x42   :  { %1869 = vmatpush3.bf16.msra.mxu1 %v2045_v53  ;;  %1934 = vmatprep.subr.bf16.mxu0 %v2046_v0 }
  0x43   :  { %989 = vmatmul.mubr.bf16.gmra.mxu0 %v1557_v34  ;;  %v1553_v34 = vcombine.low %v47_v22, %v51_v23  ;;  %1966 = vmatprep.subr.bf16.mxu1 %v2046_v0 }
  0x44   :  { %1086 = vmatmul.mubr.bf16.gmra.mxu1 %v1559_v35  ;;  %996 = vmatprep.mubr.bf16.mxu0 %v1566_v36  ;;  %v1555_v35 = vcombine.low %v48_v24, %v52_v25  ;;  %v1562_v36 = vcombine.high %v55_v30, %v59_v31 }
  0x45   :  { %1093 = vmatprep.mubr.bf16.mxu1 %v1568_v37  ;;  %v1564_v37 = vcombine.high %v56_v32, %v60_v33 }
  0x4b   :  { %997 = vmatmul.mubr.bf16.gmra.mxu0 %v1565_v47  ;;  %v75_v47 = vld [vmem:[%s2685_s0 + $0x1b0] sm:$0xff] }
  0x4c   :  { %1094 = vmatmul.mubr.bf16.gmra.mxu1 %v1567_v49  ;;  %1004 = vmatprep.mubr.bf16.mxu0 %v1574_v50  ;;  %v76_v49 = vld [vmem:[%s2685_s0 + $0x1b8] sm:$0xff]  ;;  %v1569_v50 = vcombine.low %v63_v38, %v67_v39 }
  0x4d   :  { %1101 = vmatprep.mubr.bf16.mxu1 %v1576_v52  ;;  %v1578_v52 = vcombine.high %v71_v46, %v75_v47  ;;  %v1580_v53 = vcombine.high %v72_v48, %v76_v49 }
  0x53   :  { %1005 = vmatmul.mubr.bf16.gmra.mxu0 %v1573_v58  ;;  %v1577_v58 = vcombine.low %v71_v46, %v75_v47 }
  0x54   :  { %1102 = vmatmul.mubr.bf16.gmra.mxu1 %v1575_v59  ;;  %1012 = vmatprep.mubr.bf16.mxu0 %v1582_v60  ;;  %v1579_v59 = vcombine.low %v72_v48, %v76_v49  ;;  %v1586_v60 = vcombine.high %v79_v54, %v83_v55 }
  0x55   :  { %1109 = vmatprep.mubr.bf16.mxu1 %v1584_v61  ;;  %v1588_v61 = vcombine.high %v80_v56, %v84_v57 }
  0x5b   :  { %1013 = vmatmul.mubr.bf16.gmra.mxu0 %v1581_v2  ;;  %v2048_v2 = vld [vmem:[%s2686_s3 + $0x28] sm:$0xff]  }
  0x5c   :  { %1110 = vmatmul.mubr.bf16.gmra.mxu1 %v1583_v3  ;;  %1150 = vmatprep.mubr.bf16.mxu0 %v1530_v4  ;;  %v2049_v3 = vld [vmem:[%s2686_s3 + $0x20] sm:$0xff]   ;;  %v2050_v4 = vld [vmem:[%s2686_s3 + $0x18] sm:$0xff]  }
  0x5d   :  { %1247 = vmatprep.mubr.bf16.mxu1 %v1532_v5  ;;  %v2051_v5 = vld [vmem:[%s2686_s3 + $0x10] sm:$0xff]  }
  0x63   :  { %1151 = vmatmul.mubr.bf16.vlgmr.msra.gmra.mxu0 %v1529_v10  ;;  %v2495_v10 = vld [vmem:[%s2687_s2] ss:$0 sm:$0xff] }
  0x64   :  { %1248 = vmatmul.mubr.bf16.vlgmr.msra.gmra.mxu1 %v1531_v11  ;;  %1158 = vmatprep.mubr.bf16.mxu0 %v1538_v12 }
  0x65   :  { %1255 = vmatprep.mubr.bf16.mxu1 %v1540_v13  ;;  %1935 = vmatpush3.bf16.msra.mxu0 %v2046_v0 }
  0x66   :  { %1974 = vmatpush3.bf16.msra.mxu1 %v2046_v0  ;;  %1936 = vmatprep.subr.bf16.mxu0 %v2047_v1 }
  0x67   :  { %1967 = vmatprep.subr.bf16.mxu1 %v2047_v1 }
  0x69   :  { %1937 = vmatpush3.bf16.msra.mxu0 %v2047_v1 }
  0x6a   :  { %1975 = vmatpush3.bf16.msra.mxu1 %v2047_v1  ;;  %1938 = vmatprep.subr.bf16.mxu0 %v2048_v2 }
  0x6b   :  { %1159 = vmatmul.mubr.bf16.gmra.mxu0 %v1537_v18  ;;  %1968 = vmatprep.subr.bf16.mxu1 %v2048_v2 }
  0x6c   :  { %1256 = vmatmul.mubr.bf16.gmra.mxu1 %v1539_v19  ;;  %1166 = vmatprep.mubr.bf16.mxu0 %v1546_v20 }
  0x6d   :  { %1263 = vmatprep.mubr.bf16.mxu1 %v1548_v21  ;;  %1939 = vmatpush3.bf16.msra.mxu0 %v2048_v2 }
  0x6e   :  { %1976 = vmatpush3.bf16.msra.mxu1 %v2048_v2  ;;  %1940 = vmatprep.subr.bf16.mxu0 %v2049_v3 }
  0x6f   :  { %1969 = vmatprep.subr.bf16.mxu1 %v2049_v3 }
  0x71   :  { %1941 = vmatpush3.bf16.msra.mxu0 %v2049_v3 }
  0x72   :  { %1977 = vmatpush3.bf16.msra.mxu1 %v2049_v3  ;;  %1942 = vmatprep.subr.bf16.mxu0 %v2050_v4 }
  0x73   :  { %1167 = vmatmul.mubr.bf16.gmra.mxu0 %v1545_v26  ;;  %1970 = vmatprep.subr.bf16.mxu1 %v2050_v4 }
  0x74   :  { %1264 = vmatmul.mubr.bf16.gmra.mxu1 %v1547_v27  ;;  %1174 = vmatprep.mubr.bf16.mxu0 %v1554_v28 }
  0x75   :  { %1271 = vmatprep.mubr.bf16.mxu1 %v1556_v29  ;;  %1943 = vmatpush3.bf16.msra.mxu0 %v2050_v4 }
  0x76   :  { %1978 = vmatpush3.bf16.msra.mxu1 %v2050_v4  ;;  %1944 = vmatprep.subr.bf16.mxu0 %v2051_v5 }
  0x77   :  { %1971 = vmatprep.subr.bf16.mxu1 %v2051_v5 }
  0x79   :  { %1945 = vmatpush3.bf16.msra.mxu0 %v2051_v5 }
  0x7a   :  { %1979 = vmatpush3.bf16.msra.mxu1 %v2051_v5  ;;  %1946 = vmatprep.subr.bf16.mxu0 %v2052_v6 }
  0x7b   :  { %1175 = vmatmul.mubr.bf16.gmra.mxu0 %v1553_v34  ;;  %1972 = vmatprep.subr.bf16.mxu1 %v2052_v6 }
  0x7c   :  { %1272 = vmatmul.mubr.bf16.gmra.mxu1 %v1555_v35  ;;  %1182 = vmatprep.mubr.bf16.mxu0 %v1562_v36 }
  0x7d   :  { %1279 = vmatprep.mubr.bf16.mxu1 %v1564_v37  ;;  %1947 = vmatpush3.bf16.msra.mxu0 %v2052_v6 }
  0x7e   :  { %1980 = vmatpush3.bf16.msra.mxu1 %v2052_v6  ;;  %1948 = vmatprep.subr.bf16.mxu0 %v2053_v7 }
  0x7f   :  { %1973 = vmatprep.subr.bf16.mxu1 %v2053_v7 }
  0x81   :  { %1949 = vmatpush3.bf16.msra.mxu0 %v2053_v7 }
  0x82   :  { %1981 = vmatpush3.bf16.msra.mxu1 %v2053_v7 }
  0x83   :  { %1183 = vmatmul.mubr.bf16.gmra.mxu0 %v1561_v42 }
  0x84   :  { %1280 = vmatmul.mubr.bf16.gmra.mxu1 %v1563_v43  ;;  %1190 = vmatprep.mubr.bf16.mxu0 %v1570_v44 }
  0x85   :  { %1287 = vmatprep.mubr.bf16.mxu1 %v1572_v45 }
  0x8b   :  { %1191 = vmatmul.mubr.bf16.gmra.mxu0 %v1569_v50 }
  0x8c   :  { %1288 = vmatmul.mubr.bf16.gmra.mxu1 %v1571_v51  ;;  %1198 = vmatprep.mubr.bf16.mxu0 %v1578_v52 }
  0x8d   :  { %1295 = vmatprep.mubr.bf16.mxu1 %v1580_v53 }
  0x93   :  { %1199 = vmatmul.mubr.bf16.gmra.mxu0 %v1577_v58 }
  0x94   :  { %1296 = vmatmul.mubr.bf16.gmra.mxu1 %v1579_v59  ;;  %1206 = vmatprep.mubr.bf16.mxu0 %v1586_v60 }
  0x95   :  { %1303 = vmatprep.mubr.bf16.mxu1 %v1588_v61 }
  0x9b   :  { %1207 = vmatmul.mubr.bf16.gmra.mxu0 %v1585_v62 }
  0x9c   :  { %1304 = vmatmul.mubr.bf16.gmra.mxu1 %v1587_v63 }
  0xe3   :  { %v1678_v8 = vpop.f32.mrf.mxu0 }
  0xe4   :  { %v1742_v9 = vpop.f32.mrf.mxu1 }
  0xe5   :  { %v1679_v11 = vpop.f32.mrf.mxu0 }
  0xe6   :  { %v1680_v12 = vadd.f32 %v1679_v11, %v1678_v8  ;;  %v1743_v13 = vpop.f32.mrf.mxu1 }
  0xe7   :  { %v1744_v14 = vadd.f32 %v1743_v13, %v1742_v9  ;;  %v2497_v15 = vpop.f32.mrf.mxu0 }
  0xe8   :  { %v959_v16 = vadd.f32 %v1680_v12, %v2495_v10  ;;  %v2500_v17 = vpop.f32.mrf.mxu1 }
  0xe9   :  { %v2502_v18 = vpop.f32.mrf.mxu0 }
  0xea   :  { %v2504_v19 = vadd.f32 %v1744_v14, %v959_v16  ;;  %v2506_v20 = vpop.f32.mrf.mxu1 }
  0xeb   :  { %v1684_v21 = vpop.f32.mrf.mxu0 }
  0xec   :  { %v1748_v22 = vpop.f32.mrf.mxu1 }
  0xed   :  { %v1685_v23 = vpop.f32.mrf.mxu0 }
  0xee   :  { %v1686_v24 = vadd.f32 %v1685_v23, %v1684_v21  ;;  %v1749_v25 = vpop.f32.mrf.mxu1 }
  0xef   :  { %v1750_v26 = vadd.f32 %v1749_v25, %v1748_v22  ;;  %v2508_v27 = vpop.f32.mrf.mxu0 }
  0xf0   :  { %v967_v28 = vadd.f32 %v1686_v24, %v2495_v10  ;;  %v2511_v29 = vpop.f32.mrf.mxu1 }
  0xf1   :  { %v2513_v30 = vpop.f32.mrf.mxu0 }
  0xf2   :  { %v2515_v31 = vadd.f32 %v1750_v26, %v967_v28  ;;  %v2517_v32 = vpop.f32.mrf.mxu1 }
  0xf3   :  { %v1690_v33 = vpop.f32.mrf.mxu0 }
  0xf4   :  { %v1754_v34 = vpop.f32.mrf.mxu1 }
  0xf5   :  { %v1691_v35 = vpop.f32.mrf.mxu0 }
  0xf6   :  { %v1692_v36 = vadd.f32 %v1691_v35, %v1690_v33  ;;  %v1755_v37 = vpop.f32.mrf.mxu1 }
  0xf7   :  { %v1756_v38 = vadd.f32 %v1755_v37, %v1754_v34  ;;  %v2519_v39 = vpop.f32.mrf.mxu0 }
  0xf8   :  { %v975_v40 = vadd.f32 %v1692_v36, %v2495_v10  ;;  %v2522_v41 = vpop.f32.mrf.mxu1 }
  0xf9   :  { %v2524_v42 = vpop.f32.mrf.mxu0 }
  0xfa   :  { %v2526_v43 = vadd.f32 %v1756_v38, %v975_v40  ;;  %v2528_v44 = vpop.f32.mrf.mxu1 }
  0xfb   :  { %v1696_v45 = vpop.f32.mrf.mxu0 }
  0xfc   :  { %v1760_v46 = vpop.f32.mrf.mxu1 }
  0xfd   :  { %v1697_v47 = vpop.f32.mrf.mxu0 }
  0xfe   :  { %v1698_v48 = vadd.f32 %v1697_v47, %v1696_v45  ;;  %v1761_v49 = vpop.f32.mrf.mxu1 }
  0xff   :  { %v1762_v50 = vadd.f32 %v1761_v49, %v1760_v46  ;;  %v2530_v51 = vpop.f32.mrf.mxu0 }
 0x100   :  { %v983_v52 = vadd.f32 %v1698_v48, %v2495_v10  ;;  %v2533_v53 = vpop.f32.mrf.mxu1 }
 0x101   :  { %v2535_v54 = vpop.f32.mrf.mxu0 }
 0x102   :  { %v2537_v55 = vadd.f32 %v1762_v50, %v983_v52  ;;  %v2539_v56 = vpop.f32.mrf.mxu1 }
 0x103   :  { %v1702_v57 = vpop.f32.mrf.mxu0 }
 0x104   :  { %v1766_v58 = vpop.f32.mrf.mxu1 }
 0x105   :  { %v1703_v59 = vpop.f32.mrf.mxu0 }
 0x106   :  { %v1704_v60 = vadd.f32 %v1703_v59, %v1702_v57  ;;  %v1767_v61 = vpop.f32.mrf.mxu1 }
 0x107   :  { %v1768_v62 = vadd.f32 %v1767_v61, %v1766_v58  ;;  %v2541_v63 = vpop.f32.mrf.mxu0 }
 0x108   :  { %v991_v0 = vadd.f32 %v1704_v60, %v2495_v10  ;;  %v2544_v1 = vpop.f32.mrf.mxu1  ;;  %v1683_v60 = vadd.f32 %v2502_v18, %v2497_v15  ;;  %v1689_v18 = vadd.f32 %v2513_v30, %v2508_v27 }
 0x109   :  { %v2546_v2 = vpop.f32.mrf.mxu0 }
 0x10a   :  { %v2548_v3 = vadd.f32 %v1768_v62, %v991_v0  ;;  %v2550_v4 = vpop.f32.mrf.mxu1 }
 0x10b   :  { %v1708_v5 = vpop.f32.mrf.mxu0 }
 0x10c   :  { %v1772_v6 = vpop.f32.mrf.mxu1 }
 0x10d   :  { %v1709_v7 = vpop.f32.mrf.mxu0 }
 0x10e   :  { %v1710_v8 = vadd.f32 %v1709_v7, %v1708_v5  ;;  %v1773_v9 = vpop.f32.mrf.mxu1  ;;  %v962_v7 = vadd.f32 %v1683_v60, %v2495_v10  ;;  %v1753_v60 = vadd.f32 %v2517_v32, %v2511_v29 }
 0x10f   :  { %v1774_v11 = vadd.f32 %v1773_v9, %v1772_v6  ;;  %v2552_v12 = vpop.f32.mrf.mxu0 }
 0x110   :  { %v999_v13 = vadd.f32 %v1710_v8, %v2495_v10  ;;  %v2555_v14 = vpop.f32.mrf.mxu1 }
 0x111   :  { %v2557_v16 = vpop.f32.mrf.mxu0 }
 0x112   :  { %v2559_v21 = vadd.f32 %v1774_v11, %v999_v13  ;;  %v2561_v22 = vpop.f32.mrf.mxu1  ;;  %v1747_v13 = vadd.f32 %v2506_v20, %v2500_v17 }
 0x113   :  { %v1714_v23 = vpop.f32.mrf.mxu0 }
 0x114   :  { %v1778_v24 = vpop.f32.mrf.mxu1  ;;  %v1059_v15 = vadd.f32 %v1747_v13, %v962_v7 }
 0x115   :  { %v1715_v25 = vpop.f32.mrf.mxu0 }
 0x116   :  { %v1716_v26 = vadd.f32 %v1715_v25, %v1714_v23  ;;  %v1779_v28 = vpop.f32.mrf.mxu1 }
 0x117   :  { %v1780_v33 = vadd.f32 %v1779_v28, %v1778_v24  ;;  %v2563_v34 = vpop.f32.mrf.mxu0 }
 0x118   :  { %v1007_v35 = vadd.f32 %v1716_v26, %v2495_v10  ;;  %v2566_v36 = vpop.f32.mrf.mxu1 }
 0x119   :  { %v2568_v37 = vpop.f32.mrf.mxu0 }
 0x11a   :  { %v2570_v38 = vadd.f32 %v1780_v33, %v1007_v35  ;;  %v2572_v40 = vpop.f32.mrf.mxu1 }
 0x11b   :  { %v1720_v45 = vpop.f32.mrf.mxu0 }
 0x11c   :  { %v1784_v46 = vpop.f32.mrf.mxu1 }
 0x11d   :  { %v1721_v47 = vpop.f32.mrf.mxu0 }
 0x11e   :  { %v1722_v48 = vadd.f32 %v1721_v47, %v1720_v45  ;;  %v1785_v49 = vpop.f32.mrf.mxu1 }
 0x11f   :  { %v1786_v50 = vadd.f32 %v1785_v49, %v1784_v46  ;;  %v2574_v52 = vpop.f32.mrf.mxu0 }
 0x120   :  { %v1015_v57 = vadd.f32 %v1722_v48, %v2495_v10  ;;  %v2577_v58 = vpop.f32.mrf.mxu1 }
 0x121   :  { %v2579_v59 = vpop.f32.mrf.mxu0 }
 0x122   :  { %v2583_v61 = vadd.f32 %v1786_v50, %v1015_v57  ;;  %v2585_v62 = vpop.f32.mrf.mxu1  ;;  %v970_v50 = vadd.f32 %v1689_v18, %v2495_v10 }
 0x123   :  { %v1806_v0 = vpop.f32.mrf.mxu0 }
 0x124   :  { %v1870_v5 = vpop.f32.mrf.mxu1 }
 0x125   :  { %v1807_v6 = vpop.f32.mrf.mxu0 }
 0x126   :  { %v1808_v8 = vadd.f32 %v1807_v6, %v1806_v0  ;;  %v1871_v9 = vpop.f32.mrf.mxu1  ;;  %v1695_v6 = vadd.f32 %v2524_v42, %v2519_v39  ;;  %v1759_v39 = vadd.f32 %v2528_v44, %v2522_v41 }
 0x127   :  { %v1809_v11 = vpop.f32.mrf.mxu0  ;;  %v1872_v26 = vadd.f32 %v1871_v9, %v1870_v5 }
 0x128   :  { %v1153_v23 = vadd.f32 %v1808_v8, %v2504_v19  ;;  %v1873_v24 = vpop.f32.mrf.mxu1  ;;  %v1067_v8 = vadd.f32 %v1753_v60, %v970_v50  ;;  %v978_v29 = vadd.f32 %v1695_v6, %v2495_v10  ;;  %v1701_v50 = vadd.f32 %v2535_v54, %v2530_v51 }
 0x129   :  { %v1810_v25 = vpop.f32.mrf.mxu0  ;;  %v1765_v51 = vadd.f32 %v2539_v56, %v2533_v53 }
 0x12a   :  { %v1811_v28 = vadd.f32 %v1810_v25, %v1809_v11  ;;  %v1874_v33 = vpop.f32.mrf.mxu1  ;;  %v1250_v45 = vadd.f32 %v1872_v26, %v1153_v23 }
 0x12b   :  { %v1812_v35 = vpop.f32.mrf.mxu0  ;;  %v1875_v47 = vadd.f32 %v1874_v33, %v1873_v24 }
 0x12c   :  { %v1156_v46 = vadd.f32 %v1811_v28, %v1059_v15  ;;  %v1876_v48 = vpop.f32.mrf.mxu1  ;;  %v1312_v0 = vmax.f32 %v1250_v45, 0.0 }
 0x12d   :  { %v1813_v49 = vpop.f32.mrf.mxu0 }
 0x12e   :  { %v1253_v17 = vadd.f32 %v1875_v47, %v1156_v46  ;;  %v1814_v20 = vadd.f32 %v1813_v49, %v1812_v35  ;;  %v1877_v19 = vpop.f32.mrf.mxu1 }
 0x12f   :  { %v1815_v57 = vpop.f32.mrf.mxu0  ;;  %v1878_v9 = vadd.f32 %v1877_v19, %v1876_v48  ;;  %v1075_v48 = vadd.f32 %v1759_v39, %v978_v29 }
 0x130   :  { %v1313_v27 = vmax.f32 %v1253_v17, 0.0  ;;  %v1161_v30 = vadd.f32 %v1814_v20, %v2515_v31  ;;  %v1879_v5 = vpop.f32.mrf.mxu1 }
 0x131   :  { %v1816_v7 = vpop.f32.mrf.mxu0 }
 0x132   :  { %v1817_v11 = vadd.f32 %v1816_v7, %v1815_v57  ;;  %v1880_v13 = vpop.f32.mrf.mxu1  ;;  %v1328_v23 = vpack.c.bf16 %v1313_v27, %v1312_v0  ;;  %v1258_v25 = vadd.f32 %v1878_v9, %v1161_v30 }
 0x133   :  { %v1818_v24 = vpop.f32.mrf.mxu0  ;;  %v1881_v18 = vadd.f32 %v1880_v13, %v1879_v5  ;;  %v986_v5 = vadd.f32 %v1701_v50, %v2495_v10 }
 0x134   :  { %v1164_v15 = vadd.f32 %v1817_v11, %v1067_v8  ;;  %v1882_v26 = vpop.f32.mrf.mxu1  ;;  %1950 = vmatprep.mubr.bf16.mxu0 %v1328_v23  ;;  %v1314_v35 = vmax.f32 %v1258_v25, 0.0  ;;  %v1707_v23 = vadd.f32 %v2546_v2, %v2541_v63  ;;  %v1771_v63 = vadd.f32 %v2550_v4, %v2544_v1 }
 0x135   :  { %v1819_v32 = vpop.f32.mrf.mxu0  ;;  %v1083_v25 = vadd.f32 %v1765_v51, %v986_v5 }
 0x136   :  { %v1261_v31 = vadd.f32 %v1881_v18, %v1164_v15  ;;  %v1820_v28 = vadd.f32 %v1819_v32, %v1818_v24  ;;  %v1883_v33 = vpop.f32.mrf.mxu1  ;;  %v994_v53 = vadd.f32 %v1707_v23, %v2495_v10 }
 0x137   :  { %v1821_v42 = vpop.f32.mrf.mxu0  ;;  %v1884_v20 = vadd.f32 %v1883_v33, %v1882_v26 }
 0x138   :  { %v1315_v45 = vmax.f32 %v1261_v31, 0.0  ;;  %v1169_v46 = vadd.f32 %v1820_v28, %v2526_v43  ;;  %v1885_v47 = vpop.f32.mrf.mxu1 }
 0x139   :  { %v1822_v49 = vpop.f32.mrf.mxu0 }
 0x13a   :  { %v1329_v17 = vpack.c.bf16 %v1315_v45, %v1314_v35  ;;  %v1823_v19 = vadd.f32 %v1822_v49, %v1821_v42  ;;  %v1886_v57 = vpop.f32.mrf.mxu1  ;;  %v1266_v0 = vadd.f32 %v1884_v20, %v1169_v46  ;;  %v1091_v49 = vadd.f32 %v1771_v63, %v994_v53 }
 0x13b   :  { %v1824_v60 = vpop.f32.mrf.mxu0  ;;  %v1887_v30 = vadd.f32 %v1886_v57, %v1885_v47 }
 0x13c   :  { %v1172_v27 = vadd.f32 %v1823_v19, %v1075_v48  ;;  %v1888_v41 = vpop.f32.mrf.mxu1  ;;  %1951 = vmatmul.mubr.bf16.vlgmr.msra.gmra.mxu0 %v1329_v17  ;;  %v1316_v54 = vmax.f32 %v1266_v0, 0.0  ;;  %v1713_v17 = vadd.f32 %v2557_v16, %v2552_v12  ;;  %v1777_v12 = vadd.f32 %v2561_v22, %v2555_v14 }
 0x13d   :  { %v1825_v44 = vpop.f32.mrf.mxu0 }
 0x13e   :  { %v1269_v43 = vadd.f32 %v1887_v30, %v1172_v27  ;;  %v1826_v6 = vadd.f32 %v1825_v44, %v1824_v60  ;;  %v1889_v7 = vpop.f32.mrf.mxu1  ;;  %v1002_v44 = vadd.f32 %v1713_v17, %v2495_v10 }
 0x13f   :  { %v1827_v8 = vpop.f32.mrf.mxu0  ;;  %v1890_v15 = vadd.f32 %v1889_v7, %v1888_v41 }
 0x140   :  { %v1317_v9 = vmax.f32 %v1269_v43, 0.0  ;;  %v1177_v11 = vadd.f32 %v1826_v6, %v2537_v55  ;;  %v1891_v13 = vpop.f32.mrf.mxu1 }
 0x141   :  { %v1828_v24 = vpop.f32.mrf.mxu0 }
 0x142   :  { %v1829_v18 = vadd.f32 %v1828_v24, %v1827_v8  ;;  %v1892_v26 = vpop.f32.mrf.mxu1  ;;  %v1330_v29 = vpack.c.bf16 %v1317_v9, %v1316_v54  ;;  %v1274_v31 = vadd.f32 %v1890_v15, %v1177_v11  ;;  %v1719_v54 = vadd.f32 %v2568_v37, %v2563_v34 }
 0x143   :  { %v1830_v32 = vpop.f32.mrf.mxu0  ;;  %v1893_v33 = vadd.f32 %v1892_v26, %v1891_v13  ;;  %v1099_v11 = vadd.f32 %v1777_v12, %v1002_v44  ;;  %v1783_v34 = vadd.f32 %v2572_v40, %v2566_v36 }
 0x144   :  { %v1180_v28 = vadd.f32 %v1829_v18, %v1083_v25  ;;  %v1894_v39 = vpop.f32.mrf.mxu1  ;;  %1954 = vmatprep.mubr.bf16.mxu0 %v1330_v29  ;;  %v1318_v45 = vmax.f32 %v1274_v31, 0.0  ;;  %v1010_v14 = vadd.f32 %v1719_v54, %v2495_v10 }
 0x145   :  { %v1831_v56 = vpop.f32.mrf.mxu0 }
 0x146   :  { %v1277_v55 = vadd.f32 %v1893_v33, %v1180_v28  ;;  %v1832_v42 = vadd.f32 %v1831_v56, %v1830_v32  ;;  %v1895_v35 = vpop.f32.mrf.mxu1 }
 0x147   :  { %v1833_v2 = vpop.f32.mrf.mxu0  ;;  %v1896_v20 = vadd.f32 %v1895_v35, %v1894_v39  ;;  %v1725_v35 = vadd.f32 %v2579_v59, %v2574_v52  ;;  %v1789_v52 = vadd.f32 %v2585_v62, %v2577_v58  ;;  %v1653_v58 = vld [vmem:[%s2688_s4] ss:$0 sm:$0xff] }
 0x148   :  { %v1319_v46 = vmax.f32 %v1277_v55, 0.0  ;;  %v1185_v47 = vadd.f32 %v1832_v42, %v2548_v3  ;;  %v1897_v48 = vpop.f32.mrf.mxu1  ;;  %v1107_v55 = vadd.f32 %v1783_v34, %v1010_v14 }
 0x149   :  { %v1834_v50 = vpop.f32.mrf.mxu0  ;;  %v1018_v17 = vadd.f32 %v1725_v35, %v2495_v10 }
 0x14a   :  { %v1835_v19 = vadd.f32 %v1834_v50, %v1833_v2  ;;  %v1898_v57 = vpop.f32.mrf.mxu1  ;;  %v1331_v60 = vpack.c.bf16 %v1319_v46, %v1318_v45  ;;  %v1282_v27 = vadd.f32 %v1896_v20, %v1185_v47 }
 0x14b   :  { %v1836_v0 = vpop.f32.mrf.mxu0  ;;  %v1899_v41 = vadd.f32 %v1898_v57, %v1897_v48 }
 0x14c   :  { %v1188_v30 = vadd.f32 %v1835_v19, %v1091_v49  ;;  %v1900_v1 = vpop.f32.mrf.mxu1  ;;  %1955 = vmatmul.mubr.bf16.gmra.mxu0 %v1331_v60  ;;  %v1320_v16 = vmax.f32 %v1282_v27, 0.0 }
 0x14d   :  { %v1837_v4 = vpop.f32.mrf.mxu0 }
 0x14e   :  { %v1285_v3 = vadd.f32 %v1899_v41, %v1188_v30  ;;  %v1838_v5 = vadd.f32 %v1837_v4, %v1836_v0  ;;  %v1901_v43 = vpop.f32.mrf.mxu1  ;;  %v1115_v41 = vadd.f32 %v1789_v52, %v1018_v17 }
 0x14f   :  { %v1839_v6 = vpop.f32.mrf.mxu0  ;;  %v1902_v13 = vadd.f32 %v1901_v43, %v1900_v1 }
 0x150   :  { %v1321_v7 = vmax.f32 %v1285_v3, 0.0  ;;  %v1193_v8 = vadd.f32 %v1838_v5, %v2559_v21  ;;  %v1903_v51 = vpop.f32.mrf.mxu1 }
 0x151   :  { %v1840_v9 = vpop.f32.mrf.mxu0 }
 0x152   :  { %v1841_v23 = vadd.f32 %v1840_v9, %v1839_v6  ;;  %v1904_v24 = vpop.f32.mrf.mxu1  ;;  %v1332_v25 = vpack.c.bf16 %v1321_v7, %v1320_v16  ;;  %v1290_v18 = vadd.f32 %v1902_v13, %v1193_v8 }
 0x153   :  { %v1842_v15 = vpop.f32.mrf.mxu0  ;;  %v1905_v29 = vadd.f32 %v1904_v24, %v1903_v51 }
 0x154   :  { %v1196_v26 = vadd.f32 %v1841_v23, %v1099_v11  ;;  %v1906_v32 = vpop.f32.mrf.mxu1  ;;  %1958 = vmatprep.mubr.bf16.mxu1 %v1332_v25  ;;  %v1322_v33 = vmax.f32 %v1290_v18, 0.0 }
 0x155   :  { %v1843_v22 = vpop.f32.mrf.mxu0 }
 0x156   :  { %v1293_v21 = vadd.f32 %v1905_v29, %v1196_v26  ;;  %v1844_v31 = vadd.f32 %v1843_v22, %v1842_v15  ;;  %v1907_v28 = vpop.f32.mrf.mxu1 }
 0x157   :  { %v1845_v37 = vpop.f32.mrf.mxu0  ;;  %v1908_v2 = vadd.f32 %v1907_v28, %v1906_v32 }
 0x158   :  { %v1323_v39 = vmax.f32 %v1293_v21, 0.0  ;;  %v1201_v53 = vadd.f32 %v1844_v31, %v2570_v38  ;;  %v1909_v56 = vpop.f32.mrf.mxu1 }
 0x159   :  { %v1846_v42 = vpop.f32.mrf.mxu0 }
 0x15a   :  { %v1333_v63 = vpack.c.bf16 %v1323_v39, %v1322_v33  ;;  %v1847_v45 = vadd.f32 %v1846_v42, %v1845_v37  ;;  %v1910_v46 = vpop.f32.mrf.mxu1  ;;  %v1298_v48 = vadd.f32 %v1908_v2, %v1201_v53 }
 0x15b   :  { %v1848_v47 = vpop.f32.mrf.mxu0  ;;  %v1911_v50 = vadd.f32 %v1910_v46, %v1909_v56 }
 0x15c   :  { %v1204_v49 = vadd.f32 %v1847_v45, %v1107_v55  ;;  %v1912_v36 = vpop.f32.mrf.mxu1  ;;  %1959 = vmatmul.mubr.bf16.vlgmr.msra.gmra.mxu1 %v1333_v63  ;;  %v1324_v59 = vmax.f32 %v1298_v48, 0.0 }
 0x15d   :  { %v1849_v40 = vpop.f32.mrf.mxu0 }
 0x15e   :  { %v1301_v38 = vadd.f32 %v1911_v50, %v1204_v49  ;;  %v1850_v20 = vadd.f32 %v1849_v40, %v1848_v47  ;;  %v1913_v19 = vpop.f32.mrf.mxu1 }
 0x15f   :  { %v1851_v57 = vpop.f32.mrf.mxu0  ;;  %v1914_v1 = vadd.f32 %v1913_v19, %v1912_v36 }
 0x160   :  { %v1325_v60 = vmax.f32 %v1301_v38, 0.0  ;;  %v1209_v0 = vadd.f32 %v1850_v20, %v2583_v61  ;;  %v1915_v27 = vpop.f32.mrf.mxu1 }
 0x161   :  { %v1852_v30 = vpop.f32.mrf.mxu0 }
 0x162   :  { %v1853_v4 = vadd.f32 %v1852_v30, %v1851_v57  ;;  %v1916_v44 = vpop.f32.mrf.mxu1  ;;  %v1334_v3 = vpack.c.bf16 %v1325_v60, %v1324_v59  ;;  %v1306_v5 = vadd.f32 %v1914_v1, %v1209_v0 }
 0x163   :  { %v1917_v43 = vadd.f32 %v1916_v44, %v1915_v27 }
 0x164   :  { %v1212_v10 = vadd.f32 %v1853_v4, %v1115_v41  ;;  %1962 = vmatprep.mubr.bf16.mxu1 %v1334_v3  ;;  %v1326_v12 = vmax.f32 %v1306_v5, 0.0 }
 0x166   :  { %v1309_v6 = vadd.f32 %v1917_v43, %v1212_v10 }
 0x168   :  { %v1327_v16 = vmax.f32 %v1309_v6, 0.0 }
 0x16a   :  { %v1335_v7 = vpack.c.bf16 %v1327_v16, %v1326_v12 }
 0x16c   :  { %1963 = vmatmul.mubr.bf16.gmra.mxu1 %v1335_v7 }
 0x1fc   :  { %v1952_v61 = vpop.f32.mrf.mxu0 }
 0x1fd   :  { %v1450_v62 = vadd.f32 %v1952_v61, %v1653_v58 }
 0x1fe   :  { %v1441_v8 = vpop.f32.mrf.mxu0 }
 0x1ff   :  { %1506 = vst [vmem:[%s2689_s5 + $0x10] sm:$0xff] %v1450_v62  ;;  %v1442_v51 = vadd.f32 %v1653_v58, %v1441_v8 }
 0x200   :  { %v1953_v54 = vpop.f32.mrf.mxu0 }
 0x201   :  { %1504 = vst [vmem:[%s2689_s5] sm:$0xff] %v1442_v51  ;;  %v1453_v9 = vadd.f32 %v1953_v54, %v1653_v58 }
 0x202   :  { %v1444_v11 = vpop.f32.mrf.mxu0 }
 0x203   :  { %1507 = vst [vmem:[%s2689_s5 + $0x18] sm:$0xff] %v1453_v9  ;;  %v1445_v13 = vadd.f32 %v1653_v58, %v1444_v11 }
 0x205   :  { %1505 = vst [vmem:[%s2689_s5 + $0x8] sm:$0xff] %v1445_v13 }
 0x20c   :  { %v1956_v23 = vpop.f32.mrf.mxu0 }
 0x20d   :  { %v1466_v24 = vadd.f32 %v1956_v23, %v1653_v58 }
 0x20e   :  { %v1457_v25 = vpop.f32.mrf.mxu0 }
 0x20f   :  { %1510 = vst [vmem:[%s2689_s5 + $0x30] sm:$0xff] %v1466_v24  ;;  %v1458_v15 = vadd.f32 %v1653_v58, %v1457_v25 }
 0x210   :  { %v1957_v18 = vpop.f32.mrf.mxu0 }
 0x211   :  { %1508 = vst [vmem:[%s2689_s5 + $0x20] sm:$0xff] %v1458_v15  ;;  %v1469_v26 = vadd.f32 %v1957_v18, %v1653_v58 }
 0x212   :  { %v1460_v29 = vpop.f32.mrf.mxu0 }
 0x213   :  { %1511 = vst [vmem:[%s2689_s5 + $0x38] sm:$0xff] %v1469_v26  ;;  %v1461_v32 = vadd.f32 %v1653_v58, %v1460_v29 }
 0x215   :  { %1509 = vst [vmem:[%s2689_s5 + $0x28] sm:$0xff] %v1461_v32 }
 0x21c   :  { %v1960_v14 = vpop.f32.mrf.mxu1 }
 0x21d   :  { %v1482_v22 = vadd.f32 %v1960_v14, %v1653_v58 }
 0x21e   :  { %v1473_v21 = vpop.f32.mrf.mxu1 }
 0x21f   :  { %1514 = vst [vmem:[%s2689_s5 + $0x50] sm:$0xff] %v1482_v22  ;;  %v1474_v31 = vadd.f32 %v1653_v58, %v1473_v21 }
 0x220   :  { %v1961_v28 = vpop.f32.mrf.mxu1 }
 0x221   :  { %1512 = vst [vmem:[%s2689_s5 + $0x40] sm:$0xff] %v1474_v31  ;;  %v1485_v34 = vadd.f32 %v1961_v28, %v1653_v58 }
 0x222   :  { %v1476_v37 = vpop.f32.mrf.mxu1 }
 0x223   :  { %1515 = vst [vmem:[%s2689_s5 + $0x58] sm:$0xff] %v1485_v34  ;;  %v1477_v33 = vadd.f32 %v1653_v58, %v1476_v37 }
 0x225   :  { %1513 = vst [vmem:[%s2689_s5 + $0x48] sm:$0xff] %v1477_v33 }
 0x22c   :  { %v1964_v39 = vpop.f32.mrf.mxu1 }
 0x22d   :  { %v1498_v53 = vadd.f32 %v1964_v39, %v1653_v58 }
 0x22e   :  { %v1489_v56 = vpop.f32.mrf.mxu1 }
 0x22f   :  { %1518 = vst [vmem:[%s2689_s5 + $0x70] sm:$0xff] %v1498_v53  ;;  %v1490_v55 = vadd.f32 %v1653_v58, %v1489_v56 }
 0x230   :  { %v1965_v42 = vpop.f32.mrf.mxu1 }
 0x231   :  { %1516 = vst [vmem:[%s2689_s5 + $0x60] sm:$0xff] %v1490_v55  ;;  %v1501_v35 = vadd.f32 %v1965_v42, %v1653_v58 }
 0x232   :  { %v1492_v63 = vpop.f32.mrf.mxu1 }
 0x233   :  { %1519 = vst [vmem:[%s2689_s5 + $0x78] sm:$0xff] %v1501_v35  ;;  %v1493_v2 = vadd.f32 %v1653_v58, %v1492_v63 }
 0x235   :  { %1517 = vst [vmem:[%s2689_s5 + $0x68] sm:$0xff] %v1493_v2 }

</bundles_post_ra>
